<compile_context>
chip_gen: v7x
topology: tpu7x:2x2x1
jax: 0.10.0
libtpu: 0.0.40
codegen_flags: <defaults>
</compile_context>

<pallas_src>
import functools

import jax
import jax.numpy as jnp
from jax import lax
from jax.experimental import pallas as pl
from jax.experimental.pallas import tpu as pltpu


# ----------------------------------------------------------------------------
# Fused kernel: one batch row per grid step.
#   x:      (1, T, C)
#   w_qkv:  (C, 3*n_head*H)   bf16, column order [q heads | k heads | v heads]
#   w_proj: (n_head*H, C)     bf16
#   b_proj: (1, C)            f32
#   out:    (1, T, C)         f32
#   attn:   (n_head, 1, T, T) f32   (block of the final (n_head, B, T, T) array)
# ----------------------------------------------------------------------------
def mha_kernel(x_ref, wqkv_ref, wproj_ref, bproj_ref, out_ref, attn_ref,
               *, n_head, head_size):
    T = x_ref.shape[1]
    D = n_head * head_size

    x = x_ref[0].astype(jnp.bfloat16)                       # (T, C)

    # Fused QKV projection on the MXU (bf16 inputs, f32 accumulation).
    qkv = jnp.dot(x, wqkv_ref[...],
                  preferred_element_type=jnp.float32)       # (T, 3*D) f32

    scale = jnp.float32(head_size) ** jnp.float32(-0.5)
    q_all = (qkv[:, 0 * D:1 * D] * scale).astype(jnp.bfloat16)   # scale folded into q
    k_all = qkv[:, 1 * D:2 * D].astype(jnp.bfloat16)
    v_all = qkv[:, 2 * D:3 * D].astype(jnp.bfloat16)

    # Causal mask, built once, reused by every head.
    row = lax.broadcasted_iota(jnp.int32, (T, T), 0)
    col = lax.broadcasted_iota(jnp.int32, (T, T), 1)
    causal = col <= row

    head_outs = []
    for h in range(n_head):                                  # static unroll, n_head small
        qh = q_all[:, h * head_size:(h + 1) * head_size]     # (T, H)
        kh = k_all[:, h * head_size:(h + 1) * head_size]
        vh = v_all[:, h * head_size:(h + 1) * head_size]

        s = jnp.dot(qh, kh.T, preferred_element_type=jnp.float32)   # (T, T) f32
        s = jnp.where(causal, s, -jnp.inf)

        # softmax (fp32); reciprocal on the EUP.
        m = jnp.max(s, axis=-1, keepdims=True)
        e = jnp.exp(s - m)
        denom = jnp.sum(e, axis=-1, keepdims=True)
        p = e * pl.reciprocal(denom, approx=True)

        attn_ref[h, 0] = p                                    # final layout directly
        head_outs.append(jnp.dot(p.astype(jnp.bfloat16), vh,
                                 preferred_element_type=jnp.float32))  # (T, H)

    # Concatenate heads (torch.cat(outputs, dim=-1)) and apply the output projection.
    concat = jnp.concatenate(head_outs, axis=-1).astype(jnp.bfloat16)  # (T, D)
    out_ref[0] = (jnp.dot(concat, wproj_ref[...],
                          preferred_element_type=jnp.float32)
                  + bproj_ref[...])                                    # (T, C) + (1, C)


def multi_head_attention(x, wq, wk, wv, w_proj, b_proj):
    """Pallas MultiHeadAttention forward.

    x:        (B, T, C) float32
    wq/wk/wv: (n_head, C, H)  per-head projection weights (already (in, out) oriented)
    w_proj:   (n_head*H, C)
    b_proj:   (C,)
    returns (out (B, T, C), attn_maps (n_head, B, T, T))
    """
    B, T, C = x.shape
    n_head, _, H = wq.shape
    D = n_head * H

    # One-time weight prep: fuse per-head Q/K/V weights into a single (C, 3*D) matrix,
    # column-blocked by head so q_all[:, h*H:(h+1)*H] == x @ wq[h]. Cast to bf16 for MXU.
    def heads_to_cols(w):                       # (n_head, C, H) -> (C, n_head*H)
        return jnp.transpose(w, (1, 0, 2)).reshape(C, D)

    w_qkv = jnp.concatenate(
        [heads_to_cols(wq), heads_to_cols(wk), heads_to_cols(wv)], axis=-1
    ).astype(jnp.bfloat16)                      # (C, 3*D)
    w_proj_bf16 = w_proj.astype(jnp.bfloat16)   # (D, C)
    b_proj_2d = b_proj.reshape(1, C).astype(jnp.float32)

    kernel = functools.partial(mha_kernel, n_head=n_head, head_size=H)

    out, attn_maps = pl.pallas_call(
        kernel,
        out_shape=(
            jax.ShapeDtypeStruct((B, T, C), jnp.float32),
            jax.ShapeDtypeStruct((n_head, B, T, T), jnp.float32),
        ),
        grid_spec=pltpu.PrefetchScalarGridSpec(
            num_scalar_prefetch=0,
            grid=(B,),
            in_specs=[
                pl.BlockSpec((1, T, C), lambda b: (b, 0, 0)),        # x row
                pl.BlockSpec((C, 3 * D), lambda b: (0, 0)),          # fused QKV weight (resident)
                pl.BlockSpec((D, C), lambda b: (0, 0)),              # output proj weight (resident)
                pl.BlockSpec((1, C), lambda b: (0, 0)),              # output proj bias (resident)
            ],
            out_specs=[
                pl.BlockSpec((1, T, C), lambda b: (b, 0, 0)),        # out, lane-dense (C wide)
                pl.BlockSpec((n_head, 1, T, T), lambda b: (0, b, 0, 0)),  # attn in final layout
            ],
        ),
        compiler_params=pltpu.CompilerParams(
            dimension_semantics=("parallel",),
        ),
    )(x, w_qkv, w_proj_bf16, b_proj_2d)

    return out, attn_maps


def reference(x, wq, wk, wv, w_proj, b_proj):
    """Pure-JAX fp32 reference matching the PyTorch forward."""
    B, T, C = x.shape
    n_head, _, H = wq.shape
    outs, maps = [], []
    for h in range(n_head):
        q = x @ wq[h]
        k = x @ wk[h]
        v = x @ wv[h]
        s = q @ jnp.swapaxes(k, -2, -1) * (H ** -0.5)
        mask = jnp.tril(jnp.ones((T, T), jnp.float32))
        s = jnp.where(mask == 0, -jnp.inf, s)
        p = jax.nn.softmax(s, axis=-1)
        outs.append(p @ v)
        maps.append(p)
    cat = jnp.concatenate(outs, axis=-1)
    out = cat @ w_proj + b_proj
    return out, jnp.stack(maps, axis=0)


if __name__ == "__main__":
    # Small config consistent with the module: n_embd=32, block_size>=T, n_head=4, head_size=8
    B, T, C = 2, 8, 32
    n_head, head_size = 4, 8

    key = jax.random.PRNGKey(0)
    kx, kq, kk, kv, kw, kb = jax.random.split(key, 6)

    x = jax.random.normal(kx, (B, T, C), dtype=jnp.float32)
    wq = jax.random.normal(kq, (n_head, C, head_size), dtype=jnp.float32) * 0.1
    wk = jax.random.normal(kk, (n_head, C, head_size), dtype=jnp.float32) * 0.1
    wv = jax.random.normal(kv, (n_head, C, head_size), dtype=jnp.float32) * 0.1
    w_proj = jax.random.normal(kw, (n_head * head_size, C), dtype=jnp.float32) * 0.1
    b_proj = jax.random.normal(kb, (C,), dtype=jnp.float32) * 0.1

    out, attn_maps = multi_head_attention(x, wq, wk, wv, w_proj, b_proj)
    out = jax.block_until_ready(out)
    attn_maps = jax.block_until_ready(attn_maps)

    ref_out, ref_maps = reference(x, wq, wk, wv, w_proj, b_proj)
    # bf16 MXU matmuls (fp32 accumulation) + approx reciprocal -> relaxed tolerances.
    assert jnp.allclose(out, ref_out, atol=2e-2, rtol=2e-2), "output mismatch"
    assert jnp.allclose(attn_maps, ref_maps, atol=1e-2, rtol=1e-2), "attn mismatch"

    print("KERNEL_OK")
</pallas_src>

<mosaic_0001>
module attributes {stable_mosaic.version = 11 : i64} {
  func.func @mha_kernel(%arg0: i32, %arg1: memref<1x8x32xf32, #tpu.memory_space<vmem>>, %arg2: memref<32x96xbf16, #tpu.memory_space<vmem>>, %arg3: memref<32x32xbf16, #tpu.memory_space<vmem>>, %arg4: memref<1x32xf32, #tpu.memory_space<vmem>>, %arg5: memref<1x8x32xf32, #tpu.memory_space<vmem>>, %arg6: memref<4x1x8x8xf32, #tpu.memory_space<vmem>>) attributes {dimension_semantics = [#tpu.dimension_semantics<parallel>], iteration_bounds = array<i64: 2>, scalar_prefetch = 0 : i64, scratch_operands = 0 : i64, tpu.core_type = #tpu.core_type<tc>, window_params = [{transform_indices = @transform_0, window_bounds = array<i64: 1, 8, 32>}, {pipeline_mode = #tpu.pipeline_mode<synchronous>, transform_indices = @transform_1, window_bounds = array<i64: 32, 96>}, {pipeline_mode = #tpu.pipeline_mode<synchronous>, transform_indices = @transform_2, window_bounds = array<i64: 32, 32>}, {pipeline_mode = #tpu.pipeline_mode<synchronous>, transform_indices = @transform_3, window_bounds = array<i64: 1, 32>}, {transform_indices = @transform_4, window_bounds = array<i64: 1, 8, 32>}, {transform_indices = @transform_5, window_bounds = array<i64: 4, 1, 8, 8>}]} {
    %c0 = arith.constant 0 : index
    %c0_0 = arith.constant 0 : index
    %c0_1 = arith.constant 0 : index
    %0 = vector.load %arg1[%c0, %c0_0, %c0_1] : memref<1x8x32xf32, #tpu.memory_space<vmem>>, vector<1x8x32xf32>
    %1 = vector.shape_cast %0 : vector<1x8x32xf32> to vector<8x32xf32>
    %2 = arith.truncf %1 : vector<8x32xf32> to vector<8x32xbf16>
    %c0_2 = arith.constant 0 : index
    %c0_3 = arith.constant 0 : index
    %3 = vector.load %arg2[%c0_2, %c0_3] : memref<32x96xbf16, #tpu.memory_space<vmem>>, vector<32x96xbf16>
    %cst = arith.constant dense<0.000000e+00> : vector<8x96xf32>
    %4 = tpu.matmul %2, %3, %cst {dimension_numbers = #tpu.dot_dimension_numbers<[1], [0], [0], [1], [0, 0, 1, 1], [], []>} : vector<8x32xbf16>, vector<32x96xbf16>, vector<8x96xf32> -> vector<8x96xf32>
    %cst_4 = arith.constant 8.000000e+00 : f32
    %cst_5 = arith.constant -5.000000e-01 : f32
    %5 = math.powf %cst_4, %cst_5 : f32
    %6 = vector.extract_strided_slice %4 {offsets = [0, 0], sizes = [8, 32], strides = [1, 1]} : vector<8x96xf32> to vector<8x32xf32>
    %7 = vector.broadcast %5 : f32 to vector<8x32xf32>
    %8 = arith.mulf %6, %7 : vector<8x32xf32>
    %9 = arith.truncf %8 : vector<8x32xf32> to vector<8x32xbf16>
    %10 = vector.extract_strided_slice %4 {offsets = [0, 32], sizes = [8, 32], strides = [1, 1]} : vector<8x96xf32> to vector<8x32xf32>
    %11 = arith.truncf %10 : vector<8x32xf32> to vector<8x32xbf16>
    %12 = vector.extract_strided_slice %4 {offsets = [0, 64], sizes = [8, 32], strides = [1, 1]} : vector<8x96xf32> to vector<8x32xf32>
    %13 = arith.truncf %12 : vector<8x32xf32> to vector<8x32xbf16>
    %14 = tpu.iota {dimensions = array<i32: 0>} : vector<8x8xi32>
    %15 = tpu.iota {dimensions = array<i32: 1>} : vector<8x8xi32>
    %16 = arith.cmpi sle, %15, %14 : vector<8x8xi32>
    %17 = vector.extract_strided_slice %9 {offsets = [0, 0], sizes = [8, 8], strides = [1, 1]} : vector<8x32xbf16> to vector<8x8xbf16>
    %18 = vector.extract_strided_slice %11 {offsets = [0, 0], sizes = [8, 8], strides = [1, 1]} : vector<8x32xbf16> to vector<8x8xbf16>
    %19 = vector.extract_strided_slice %13 {offsets = [0, 0], sizes = [8, 8], strides = [1, 1]} : vector<8x32xbf16> to vector<8x8xbf16>
    %20 = tpu.transpose %18, [1, 0] : vector<8x8xbf16> -> vector<8x8xbf16>
    %cst_6 = arith.constant dense<0.000000e+00> : vector<8x8xf32>
    %21 = tpu.matmul %17, %20, %cst_6 {dimension_numbers = #tpu.dot_dimension_numbers<[1], [0], [0], [1], [0, 0, 1, 1], [], []>} : vector<8x8xbf16>, vector<8x8xbf16>, vector<8x8xf32> -> vector<8x8xf32>
    %cst_7 = arith.constant 0xFF800000 : f32
    %22 = vector.broadcast %cst_7 : f32 to vector<8x8xf32>
    %23 = arith.select %16, %21, %22 : vector<8x8xi1>, vector<8x8xf32>
    %cst_8 = arith.constant dense<0xFF800000> : vector<8xf32>
    %24 = vector.multi_reduction <maximumf>, %23, %cst_8 [1] : vector<8x8xf32> to vector<8xf32>
    %25 = vector.shape_cast %24 : vector<8xf32> to vector<8x1xf32>
    %26 = vector.broadcast %25 : vector<8x1xf32> to vector<8x8xf32>
    %27 = arith.subf %23, %26 : vector<8x8xf32>
    %28 = math.exp %27 : vector<8x8xf32>
    %cst_9 = arith.constant dense<0.000000e+00> : vector<8xf32>
    %29 = vector.multi_reduction <add>, %28, %cst_9 [1] : vector<8x8xf32> to vector<8xf32>
    %30 = vector.shape_cast %29 : vector<8xf32> to vector<8x1xf32>
    %31 = tpu.reciprocal %30 {approx = true} : vector<8x1xf32> -> vector<8x1xf32>
    %32 = vector.broadcast %31 : vector<8x1xf32> to vector<8x8xf32>
    %33 = arith.mulf %28, %32 : vector<8x8xf32>
    %c0_10 = arith.constant 0 : index
    %c0_11 = arith.constant 0 : index
    %c0_12 = arith.constant 0 : index
    %c0_13 = arith.constant 0 : index
    %34 = vector.load %arg6[%c0_10, %c0_11, %c0_12, %c0_13] : memref<4x1x8x8xf32, #tpu.memory_space<vmem>>, vector<1x1x8x8xf32>
    %35 = vector.shape_cast %34 : vector<1x1x8x8xf32> to vector<8x8xf32>
    %36 = vector.shape_cast %33 : vector<8x8xf32> to vector<1x1x8x8xf32>
    tpu.vector_store %arg6[%c0_10, %c0_11, %c0_12, %c0_13], %36 {strides = array<i32>} : memref<4x1x8x8xf32, #tpu.memory_space<vmem>>, vector<1x1x8x8xf32>,
    %37 = arith.truncf %33 : vector<8x8xf32> to vector<8x8xbf16>
    %cst_14 = arith.constant dense<0.000000e+00> : vector<8x8xf32>
    %38 = tpu.matmul %37, %19, %cst_14 {dimension_numbers = #tpu.dot_dimension_numbers<[1], [0], [0], [1], [0, 0, 1, 1], [], []>} : vector<8x8xbf16>, vector<8x8xbf16>, vector<8x8xf32> -> vector<8x8xf32>
    %39 = vector.extract_strided_slice %9 {offsets = [0, 8], sizes = [8, 8], strides = [1, 1]} : vector<8x32xbf16> to vector<8x8xbf16>
    %40 = vector.extract_strided_slice %11 {offsets = [0, 8], sizes = [8, 8], strides = [1, 1]} : vector<8x32xbf16> to vector<8x8xbf16>
    %41 = vector.extract_strided_slice %13 {offsets = [0, 8], sizes = [8, 8], strides = [1, 1]} : vector<8x32xbf16> to vector<8x8xbf16>
    %42 = tpu.transpose %40, [1, 0] : vector<8x8xbf16> -> vector<8x8xbf16>
    %cst_15 = arith.constant dense<0.000000e+00> : vector<8x8xf32>
    %43 = tpu.matmul %39, %42, %cst_15 {dimension_numbers = #tpu.dot_dimension_numbers<[1], [0], [0], [1], [0, 0, 1, 1], [], []>} : vector<8x8xbf16>, vector<8x8xbf16>, vector<8x8xf32> -> vector<8x8xf32>
    %cst_16 = arith.constant 0xFF800000 : f32
    %44 = vector.broadcast %cst_16 : f32 to vector<8x8xf32>
    %45 = arith.select %16, %43, %44 : vector<8x8xi1>, vector<8x8xf32>
    %cst_17 = arith.constant dense<0xFF800000> : vector<8xf32>
    %46 = vector.multi_reduction <maximumf>, %45, %cst_17 [1] : vector<8x8xf32> to vector<8xf32>
    %47 = vector.shape_cast %46 : vector<8xf32> to vector<8x1xf32>
    %48 = vector.broadcast %47 : vector<8x1xf32> to vector<8x8xf32>
    %49 = arith.subf %45, %48 : vector<8x8xf32>
    %50 = math.exp %49 : vector<8x8xf32>
    %cst_18 = arith.constant dense<0.000000e+00> : vector<8xf32>
    %51 = vector.multi_reduction <add>, %50, %cst_18 [1] : vector<8x8xf32> to vector<8xf32>
    %52 = vector.shape_cast %51 : vector<8xf32> to vector<8x1xf32>
    %53 = tpu.reciprocal %52 {approx = true} : vector<8x1xf32> -> vector<8x1xf32>
    %54 = vector.broadcast %53 : vector<8x1xf32> to vector<8x8xf32>
    %55 = arith.mulf %50, %54 : vector<8x8xf32>
    %c1 = arith.constant 1 : index
    %c0_19 = arith.constant 0 : index
    %c0_20 = arith.constant 0 : index
    %c0_21 = arith.constant 0 : index
    %56 = vector.load %arg6[%c1, %c0_19, %c0_20, %c0_21] : memref<4x1x8x8xf32, #tpu.memory_space<vmem>>, vector<1x1x8x8xf32>
    %57 = vector.shape_cast %56 : vector<1x1x8x8xf32> to vector<8x8xf32>
    %58 = vector.shape_cast %55 : vector<8x8xf32> to vector<1x1x8x8xf32>
    tpu.vector_store %arg6[%c1, %c0_19, %c0_20, %c0_21], %58 {strides = array<i32>} : memref<4x1x8x8xf32, #tpu.memory_space<vmem>>, vector<1x1x8x8xf32>,
    %59 = arith.truncf %55 : vector<8x8xf32> to vector<8x8xbf16>
    %cst_22 = arith.constant dense<0.000000e+00> : vector<8x8xf32>
    %60 = tpu.matmul %59, %41, %cst_22 {dimension_numbers = #tpu.dot_dimension_numbers<[1], [0], [0], [1], [0, 0, 1, 1], [], []>} : vector<8x8xbf16>, vector<8x8xbf16>, vector<8x8xf32> -> vector<8x8xf32>
    %61 = vector.extract_strided_slice %9 {offsets = [0, 16], sizes = [8, 8], strides = [1, 1]} : vector<8x32xbf16> to vector<8x8xbf16>
    %62 = vector.extract_strided_slice %11 {offsets = [0, 16], sizes = [8, 8], strides = [1, 1]} : vector<8x32xbf16> to vector<8x8xbf16>
    %63 = vector.extract_strided_slice %13 {offsets = [0, 16], sizes = [8, 8], strides = [1, 1]} : vector<8x32xbf16> to vector<8x8xbf16>
    %64 = tpu.transpose %62, [1, 0] : vector<8x8xbf16> -> vector<8x8xbf16>
    %cst_23 = arith.constant dense<0.000000e+00> : vector<8x8xf32>
    %65 = tpu.matmul %61, %64, %cst_23 {dimension_numbers = #tpu.dot_dimension_numbers<[1], [0], [0], [1], [0, 0, 1, 1], [], []>} : vector<8x8xbf16>, vector<8x8xbf16>, vector<8x8xf32> -> vector<8x8xf32>
    %cst_24 = arith.constant 0xFF800000 : f32
    %66 = vector.broadcast %cst_24 : f32 to vector<8x8xf32>
    %67 = arith.select %16, %65, %66 : vector<8x8xi1>, vector<8x8xf32>
    %cst_25 = arith.constant dense<0xFF800000> : vector<8xf32>
    %68 = vector.multi_reduction <maximumf>, %67, %cst_25 [1] : vector<8x8xf32> to vector<8xf32>
    %69 = vector.shape_cast %68 : vector<8xf32> to vector<8x1xf32>
    %70 = vector.broadcast %69 : vector<8x1xf32> to vector<8x8xf32>
    %71 = arith.subf %67, %70 : vector<8x8xf32>
    %72 = math.exp %71 : vector<8x8xf32>
    %cst_26 = arith.constant dense<0.000000e+00> : vector<8xf32>
    %73 = vector.multi_reduction <add>, %72, %cst_26 [1] : vector<8x8xf32> to vector<8xf32>
    %74 = vector.shape_cast %73 : vector<8xf32> to vector<8x1xf32>
    %75 = tpu.reciprocal %74 {approx = true} : vector<8x1xf32> -> vector<8x1xf32>
    %76 = vector.broadcast %75 : vector<8x1xf32> to vector<8x8xf32>
    %77 = arith.mulf %72, %76 : vector<8x8xf32>
    %c2 = arith.constant 2 : index
    %c0_27 = arith.constant 0 : index
    %c0_28 = arith.constant 0 : index
    %c0_29 = arith.constant 0 : index
    %78 = vector.load %arg6[%c2, %c0_27, %c0_28, %c0_29] : memref<4x1x8x8xf32, #tpu.memory_space<vmem>>, vector<1x1x8x8xf32>
    %79 = vector.shape_cast %78 : vector<1x1x8x8xf32> to vector<8x8xf32>
    %80 = vector.shape_cast %77 : vector<8x8xf32> to vector<1x1x8x8xf32>
    tpu.vector_store %arg6[%c2, %c0_27, %c0_28, %c0_29], %80 {strides = array<i32>} : memref<4x1x8x8xf32, #tpu.memory_space<vmem>>, vector<1x1x8x8xf32>,
    %81 = arith.truncf %77 : vector<8x8xf32> to vector<8x8xbf16>
    %cst_30 = arith.constant dense<0.000000e+00> : vector<8x8xf32>
    %82 = tpu.matmul %81, %63, %cst_30 {dimension_numbers = #tpu.dot_dimension_numbers<[1], [0], [0], [1], [0, 0, 1, 1], [], []>} : vector<8x8xbf16>, vector<8x8xbf16>, vector<8x8xf32> -> vector<8x8xf32>
    %83 = vector.extract_strided_slice %9 {offsets = [0, 24], sizes = [8, 8], strides = [1, 1]} : vector<8x32xbf16> to vector<8x8xbf16>
    %84 = vector.extract_strided_slice %11 {offsets = [0, 24], sizes = [8, 8], strides = [1, 1]} : vector<8x32xbf16> to vector<8x8xbf16>
    %85 = vector.extract_strided_slice %13 {offsets = [0, 24], sizes = [8, 8], strides = [1, 1]} : vector<8x32xbf16> to vector<8x8xbf16>
    %86 = tpu.transpose %84, [1, 0] : vector<8x8xbf16> -> vector<8x8xbf16>
    %cst_31 = arith.constant dense<0.000000e+00> : vector<8x8xf32>
    %87 = tpu.matmul %83, %86, %cst_31 {dimension_numbers = #tpu.dot_dimension_numbers<[1], [0], [0], [1], [0, 0, 1, 1], [], []>} : vector<8x8xbf16>, vector<8x8xbf16>, vector<8x8xf32> -> vector<8x8xf32>
    %cst_32 = arith.constant 0xFF800000 : f32
    %88 = vector.broadcast %cst_32 : f32 to vector<8x8xf32>
    %89 = arith.select %16, %87, %88 : vector<8x8xi1>, vector<8x8xf32>
    %cst_33 = arith.constant dense<0xFF800000> : vector<8xf32>
    %90 = vector.multi_reduction <maximumf>, %89, %cst_33 [1] : vector<8x8xf32> to vector<8xf32>
    %91 = vector.shape_cast %90 : vector<8xf32> to vector<8x1xf32>
    %92 = vector.broadcast %91 : vector<8x1xf32> to vector<8x8xf32>
    %93 = arith.subf %89, %92 : vector<8x8xf32>
    %94 = math.exp %93 : vector<8x8xf32>
    %cst_34 = arith.constant dense<0.000000e+00> : vector<8xf32>
    %95 = vector.multi_reduction <add>, %94, %cst_34 [1] : vector<8x8xf32> to vector<8xf32>
    %96 = vector.shape_cast %95 : vector<8xf32> to vector<8x1xf32>
    %97 = tpu.reciprocal %96 {approx = true} : vector<8x1xf32> -> vector<8x1xf32>
    %98 = vector.broadcast %97 : vector<8x1xf32> to vector<8x8xf32>
    %99 = arith.mulf %94, %98 : vector<8x8xf32>
    %c3 = arith.constant 3 : index
    %c0_35 = arith.constant 0 : index
    %c0_36 = arith.constant 0 : index
    %c0_37 = arith.constant 0 : index
    %100 = vector.load %arg6[%c3, %c0_35, %c0_36, %c0_37] : memref<4x1x8x8xf32, #tpu.memory_space<vmem>>, vector<1x1x8x8xf32>
    %101 = vector.shape_cast %100 : vector<1x1x8x8xf32> to vector<8x8xf32>
    %102 = vector.shape_cast %99 : vector<8x8xf32> to vector<1x1x8x8xf32>
    tpu.vector_store %arg6[%c3, %c0_35, %c0_36, %c0_37], %102 {strides = array<i32>} : memref<4x1x8x8xf32, #tpu.memory_space<vmem>>, vector<1x1x8x8xf32>,
    %103 = arith.truncf %99 : vector<8x8xf32> to vector<8x8xbf16>
    %cst_38 = arith.constant dense<0.000000e+00> : vector<8x8xf32>
    %104 = tpu.matmul %103, %85, %cst_38 {dimension_numbers = #tpu.dot_dimension_numbers<[1], [0], [0], [1], [0, 0, 1, 1], [], []>} : vector<8x8xbf16>, vector<8x8xbf16>, vector<8x8xf32> -> vector<8x8xf32>
    %105 = tpu.concatenate %38, %60, %82, %104 in 1 : vector<8x8xf32>, vector<8x8xf32>, vector<8x8xf32>, vector<8x8xf32> -> vector<8x32xf32>
    %106 = arith.truncf %105 : vector<8x32xf32> to vector<8x32xbf16>
    %c0_39 = arith.constant 0 : index
    %c0_40 = arith.constant 0 : index
    %107 = vector.load %arg3[%c0_39, %c0_40] : memref<32x32xbf16, #tpu.memory_space<vmem>>, vector<32x32xbf16>
    %cst_41 = arith.constant dense<0.000000e+00> : vector<8x32xf32>
    %108 = tpu.matmul %106, %107, %cst_41 {dimension_numbers = #tpu.dot_dimension_numbers<[1], [0], [0], [1], [0, 0, 1, 1], [], []>} : vector<8x32xbf16>, vector<32x32xbf16>, vector<8x32xf32> -> vector<8x32xf32>
    %c0_42 = arith.constant 0 : index
    %c0_43 = arith.constant 0 : index
    %109 = vector.load %arg4[%c0_42, %c0_43] : memref<1x32xf32, #tpu.memory_space<vmem>>, vector<1x32xf32>
    %110 = vector.broadcast %109 : vector<1x32xf32> to vector<8x32xf32>
    %111 = arith.addf %108, %110 : vector<8x32xf32>
    %c0_44 = arith.constant 0 : index
    %c0_45 = arith.constant 0 : index
    %c0_46 = arith.constant 0 : index
    %112 = vector.load %arg5[%c0_44, %c0_45, %c0_46] : memref<1x8x32xf32, #tpu.memory_space<vmem>>, vector<1x8x32xf32>
    %113 = vector.shape_cast %112 : vector<1x8x32xf32> to vector<8x32xf32>
    %114 = vector.shape_cast %111 : vector<8x32xf32> to vector<1x8x32xf32>
    tpu.vector_store %arg5[%c0_44, %c0_45, %c0_46], %114 {strides = array<i32>} : memref<1x8x32xf32, #tpu.memory_space<vmem>>, vector<1x8x32xf32>,
    return
  }
  func.func @transform_0(%arg0: i32) -> (i32, i32, i32) {
    %c0_i32 = arith.constant 0 : i32
    %c0_i32_0 = arith.constant 0 : i32
    %c0_i32_1 = arith.constant 0 : i32
    return %arg0, %c0_i32, %c0_i32_0 : i32, i32, i32
  }
  func.func @transform_1(%arg0: i32) -> (i32, i32) {
    %c0_i32 = arith.constant 0 : i32
    %c0_i32_0 = arith.constant 0 : i32
    %c0_i32_1 = arith.constant 0 : i32
    return %c0_i32, %c0_i32_0 : i32, i32
  }
  func.func @transform_2(%arg0: i32) -> (i32, i32) {
    %c0_i32 = arith.constant 0 : i32
    %c0_i32_0 = arith.constant 0 : i32
    %c0_i32_1 = arith.constant 0 : i32
    return %c0_i32, %c0_i32_0 : i32, i32
  }
  func.func @transform_3(%arg0: i32) -> (i32, i32) {
    %c0_i32 = arith.constant 0 : i32
    %c0_i32_0 = arith.constant 0 : i32
    %c0_i32_1 = arith.constant 0 : i32
    return %c0_i32, %c0_i32_0 : i32, i32
  }
  func.func @transform_4(%arg0: i32) -> (i32, i32, i32) {
    %c0_i32 = arith.constant 0 : i32
    %c0_i32_0 = arith.constant 0 : i32
    %c0_i32_1 = arith.constant 0 : i32
    return %arg0, %c0_i32, %c0_i32_0 : i32, i32, i32
  }
  func.func @transform_5(%arg0: i32) -> (i32, i32, i32, i32) {
    %c0_i32 = arith.constant 0 : i32
    %c0_i32_0 = arith.constant 0 : i32
    %c0_i32_1 = arith.constant 0 : i32
    %c0_i32_2 = arith.constant 0 : i32
    return %c0_i32, %arg0, %c0_i32_0, %c0_i32_1 : i32, i32, i32, i32
  }
}

</mosaic_0001>

<bundles_post_ra>
// kernel: tpu_custom_call.1
= control target key start
LH: loop header
LB: loop body
LE: loop exit
PB: predicated region body
PF: predicated region fallthrough
CT: control target
= control target key end

     0   :  { %11 = vsyncpa [#allocation3], 0  ;;  %s1883_s0 = inlined_call_operand.hbm [shape: f32[2,8,32], index: 0, kind: input, shape index: {}]   ;;  %s1884_s1 = inlined_call_operand.hbm [shape: bf16[32,96], index: 1, kind: input, shape index: {}]   ;;  %s1885_s2 = inlined_call_operand.hbm [shape: bf16[32,32], index: 2, kind: input, shape index: {}]   ;;  %s1886_s3 = inlined_call_operand.vmem [shape: f32[1,32], index: 3, kind: input, shape index: {}]   ;;  %s1887_s4 = inlined_call_operand.hbm [shape: f32[2,8,32], index: 4, kind: output, shape index: {0}]   ;;  %s1888_s5 = inlined_call_operand.hbm [shape: f32[4,2,8,8], index: 5, kind: output, shape index: {1}]  }
   0x1   :  { %13 = vsyncpa [#allocation3 + $0x1], 0 }
   0x2   :  { %14 = vsyncpa [#allocation6], 0 }
   0x3   :  { %15 = vsyncpa [#allocation4], 0 }
   0x4   :  { %17 = vsyncpa [#allocation4 + $0x1], 0 }
   0x5   :  { %18 = vsyncpa [#allocation10], 0 }
   0x6   :  { %20 = vsyncpa [#allocation10 + $0x1], 0  ;;  %s1524_s18 = smov 0   ;;  %s1526_s19 = smov 0  }
   0x7   :  { %s1528_s20 = smov 0   ;;  %s1530_s21 = smov 0  }
   0x8 LB: > { %s1545_s22 = sadd.s32 4294967295, %s1467_s21   ;;  %s1044_s23 = sadd.s32 4294967294, %s1467_s21   ;;  %s1467_s21 = sphi %s1530_s21, %s1908_s21   ;;  %s1463_s20 = sphi %s1528_s20, %s1907_s20   ;;  %s1459_s19 = sphi %s1526_s19, %s1906_s19   ;;  %s1455_s18 = sphi %s1524_s18, %s1905_s18  }
   0x9   : > { %p46_p0 = scmp.ne.s32.totalorder %s1459_s19, %s1455_s18  ;;  %p1889_p1 = scmp.eq.s32.totalorder %s1545_s22, 0 }
   0xa   : > { %p139_p3 = scmp.eq.s32.totalorder %s1044_s23, 1  ;;  %p1045_p5 = scmp.ge.s32.totalorder %s1467_s21, 1 }
   0xb   : > { %p1554_p4 = por %p1889_p1, %p46_p0  ;;  %p172_p7 = scmp.lt.s32.totalorder %s1467_s21, 3 }
   0xc   : > { %p1559_p6 = por %p139_p3, %p46_p0  ;;  %s1469_s27 = smov [#allocation5]  }
   0xd   : > { %s1892_s24 = scalar_select %p1554_p4, 1, 0 }
   0xe   : > { %s1893_s25 = scalar_select %p1559_p6, 1, 0 }
   0xf   : > { %p1564_p8 = pnand %p1045_p5, %p172_p7  ;;  %s184_s28 = sshll.u32 %s1469_s27, 4  ;;  %s1568_s28 = int_to_ptr.vmem [resolvable:$true] %s184_s28 }
  0x10   : > { %s1470_s30 = smov [#allocation7]   ;;  %s1279_s9 = scalar_lea.hbm %s1884_s1, 256 }
  0x11   : > { %p1181_p9 = pneg %p1564_p8  ;;  %s197_s6 = sshll.u32 %s1470_s30, 4  ;;  %s1579_s6 = int_to_ptr.vmem [resolvable:$true] %s197_s6 }
  0x12   : > { %p1280_p12 = scmp.ne.s32.totalorder %s1884_s1, %s1279_s9  ;;  %p1286_p5 = scmp.lt.u32.totalorder %s1279_s9, %s1884_s1 }
  0x13   : > { %p1575_p11 = pnand %p1181_p9, %p1889_p1 }
  0x15   : > { %p1281_p13 = pneg %p1575_p11 }
  0x17   : > { %p1282_p0 = pnand %p1281_p13, %p1280_p12 }
  0x19   : > { %p1283_p3 = pneg %p1282_p0 }
  0x1b   : > { %p1288_p7 = pnand %p1286_p5, %p1283_p3 }
  0x1d   : > { %1291 = shalt.err (!%p1288_p7)
}
  0x1e   : > { %s1292_s14 = scalar_lea.vmem %s1568_s28, 256  ;;  %p1300_p2 = scmp.lt.s32.totalorder %s1568_s28, %s1568_s28 }
  0x1f   : > { %p1293_p9 = scmp.ne.s32.totalorder %s1568_s28, %s1292_s14  ;;  %p1301_p12 = scmp.lt.s32.totalorder %s1292_s14, %s1292_s14 }
  0x21   : > { %p1295_p10 = pnand %p1293_p9, %p1281_p13  ;;  %p1302_p0 = por %p1301_p12, %p1300_p2 }
  0x23   : > { %p1296_p1 = pneg %p1295_p10 }
  0x25   : > { %p1303_p6 = pnand %p1302_p0, %p1296_p1 }
  0x27   : > { %1306 = shalt.err (!%p1303_p6)
}
  0x28   : > { %s1471_s15 = smov 64   ;;  %s1472_s16 = smov 4  }
  0x29   : > { %1184 = dma.hbm_to_vmem [thread:$0]  (!%p1575_p11), %s1884_s1, 256, %s1568_s28, [#allocation6], %s1471_s15, %s1471_s15, %s1472_s16  }
  0x2a   : > { %s1307_s7 = scalar_lea.hbm %s1885_s2, 256 }
  0x2b   : > { %p1308_p2 = scmp.ne.s32.totalorder %s1885_s2, %s1307_s7  ;;  %p1314_p10 = scmp.lt.u32.totalorder %s1307_s7, %s1885_s2 }
  0x2d   : > { %p1310_p1 = pnand %p1308_p2, %p1281_p13 }
  0x2f   : > { %p1311_p6 = pneg %p1310_p1 }
  0x31   : > { %p1316_p3 = pnand %p1314_p10, %p1311_p6 }
  0x33   : > { %1319 = shalt.err (!%p1316_p3)
}
  0x34   : > { %s1320_s28 = scalar_lea.vmem %s1579_s6, 256  ;;  %p1328_p12 = scmp.lt.s32.totalorder %s1579_s6, %s1579_s6 }
  0x35   : > { %p1321_p5 = scmp.ne.s32.totalorder %s1579_s6, %s1320_s28  ;;  %p1329_p0 = scmp.lt.s32.totalorder %s1320_s28, %s1320_s28 }
  0x37   : > { %p1323_p7 = pnand %p1321_p5, %p1281_p13  ;;  %p1330_p2 = por %p1329_p0, %p1328_p12 }
  0x39   : > { %p1324_p9 = pneg %p1323_p7 }
  0x3b   : > { %p1331_p1 = pnand %p1330_p2, %p1324_p9 }
  0x3d   : > { %1334 = shalt.err (!%p1331_p1)
}
  0x3e   : > { %1187 = dma.hbm_to_vmem [thread:$0]  (!%p1575_p11), %s1885_s2, 256, %s1579_s6, [#allocation6], %s1471_s15, %s1471_s15, %s1472_s16  }
  0x3f   : > { %s1634_s14 = sadd.s32 1, %s1467_s21   ;;  %s33_s29 = sadd.s32 1, %s1463_s20 }
  0x40   : > { %s30_s17 = ssub.s32 %s1467_s21, %s1634_s14  ;;  %p40_p13 = scmp.ne.s32.totalorder %s1463_s20, %s1459_s19 }
  0x41   : > { %p31_p6 = scmp.eq.s32.totalorder %s30_s17, 0  ;;  %p41_p10 = scmp.eq.s32.totalorder %s1467_s21, 0 }
  0x42   : > { %p1896_p3 = scmp.eq.s32.totalorder %s1545_s22, 1  ;;  %p1201_p7 = scmp.lt.s32.totalorder %s1467_s21, 2 }
  0x43   : > { %s1650_s27 = scalar_select %p31_p6, %s1463_s20, %s33_s29  }
  0x44   : > { %p1644_p5 = por %p1896_p3, %p40_p13  ;;  %p42_p9 = por %p41_p10, %p40_p13 }
  0x45   : > { %s214_s30 = sand.u32 1, %s1463_s20   ;;  %s1050_s6 = sshll.u32 %s1467_s21, 7 }
  0x46   : > { %s1897_s23 = scalar_select %p1644_p5, 1, 0 }
  0x47   : > { %s1049_s7 = sshll.u32 %s214_s30, 3  ;;  %s1657_s8 = scalar_lea.hbm %s1883_s0, %s1050_s6 }
  0x48   : > { %s218_s9 = scalar_lea.vmem [#allocation2], %s1049_s7  ;;  %p1661_p11 = pnand %p1201_p7, %p42_p9 }
  0x49   : > { %s225_s10 = sshll.u32 %s218_s9, 4  ;;  %s215_s28 = scalar_lea.sflag [#allocation3], %s214_s30  ;;  %s1659_s10 = int_to_ptr.vmem [resolvable:$true] %s225_s10 }
  0x4a   : > { %s1335_s12 = scalar_lea.hbm %s1657_s8, 128  ;;  %p1337_p0 = pneg %p1661_p11 }
  0x4b   : > { %p1336_p12 = scmp.ne.s32.totalorder %s1657_s8, %s1335_s12  ;;  %s1340_s17 = scalar_lea.hbm %s1883_s0, 256 }
  0x4c   : > { %p1341_p13 = scmp.lt.u32.totalorder %s1657_s8, %s1883_s0  ;;  %p1342_p6 = scmp.lt.u32.totalorder %s1340_s17, %s1335_s12 }
  0x4d   : > { %p1338_p2 = pnand %p1337_p0, %p1336_p12  ;;  %p1344_p3 = scmp.lt.u32.totalorder %s1335_s12, %s1657_s8 }
  0x4e   : > { %p1343_p10 = por %p1342_p6, %p1341_p13 }
  0x4f   : > { %p1339_p1 = pneg %p1338_p2 }
  0x50   : > { %p1345_p7 = por %p1344_p3, %p1343_p10 }
  0x52   : > { %p1346_p9 = pnand %p1345_p7, %p1339_p1 }
  0x54   : > { %1349 = shalt.err (!%p1346_p9)
}
  0x55   : > { %s1350_s30 = scalar_lea.vmem %s1659_s10, 128  ;;  %s1473_s15 = smov [#allocation2]  }
  0x56   : > { %p1351_p12 = scmp.ne.s32.totalorder %s1659_s10, %s1350_s30  ;;  %s1355_s16 = sshll.u32 %s1473_s15, 4  ;;  %s1356_s16 = int_to_ptr.vmem [resolvable:$false] %s1355_s16 }
  0x57   : > { %s1357_s9 = scalar_lea.vmem %s1356_s16, 256  ;;  %p1358_p4 = scmp.lt.s32.totalorder %s1659_s10, %s1356_s16 }
  0x58   : > { %p1353_p2 = pnand %p1351_p12, %p1337_p0  ;;  %p1359_p13 = scmp.lt.s32.totalorder %s1357_s9, %s1350_s30 }
  0x5a   : > { %p1354_p5 = pneg %p1353_p2  ;;  %p1360_p6 = por %p1359_p13, %p1358_p4 }
  0x5c   : > { %p1361_p10 = pnand %p1360_p6, %p1354_p5 }
  0x5e   : > { %1364 = shalt.err (!%p1361_p10)
}
  0x5f   : > { %1191 = dma.hbm_to_vmem [thread:$0]  (!%p1661_p11), %s1657_s8, 128, %s1659_s10, %s215_s28  }
  0x60   : > { %234 = sbr.rel (%p1564_p8) target bundleno = 1603 (0x643), region = 36  ;;  %s1693_s12 = sand.u32 (!%p1564_p8), 1, %s1459_s19  }
  0x61   : > { %s1052_s13 = sshll.u32 (!%p1564_p8), %s1693_s12, 3  ;;  %s237_s29 = scalar_lea.sflag (!%p1564_p8), [#allocation3], %s1693_s12 }
  0x62   : > { %s240_s17 = scalar_lea.vmem (!%p1564_p8), [#allocation2], %s1052_s13  ;;  %p1899_p4 = scmp.ne.s32.totalorder (!%p1564_p8), %s1892_s24, 0 }
  0x67   : > { %1438 = dma.done.wait (%p1899_p4), %s237_s29, 128  }
  0x68   : > { %1440 = vsyncadd (%p1899_p4), %s237_s29, 4294967168  ;;  %p1900_p5 = scmp.eq.s32.totalorder %s1545_s22, 0 }
  0x6a   : > { %1442 = dma.done.wait (%p1900_p5), [#allocation6], 512   ;;  %p1901_p8 = pmov %p1900_p5 }
  0x6b   : > { %v1474_v0 = vmov 0.0   ;;  %vm1475_vm0 = vmmov 0   ;;  %v1259_v1 = vld [vmem:[#allocation5] sm:$0xff]   ;;  %v1260_v2 = vld [vmem:[#allocation5 + $0x8] sm:$0xff]   ;;  %v281_v3 = vld [vmem:[%s240_s17] sm:$0xff]  ;;  %vm299_vm1 = vcmask 261120   ;;  %v346_v23 = vlaneseq }
  0x6c   : > { %1444 = vsyncadd (%p1901_p8), [#allocation6], 4294966784  ;;  %1103 = vmatprep.subr.bf16.mxu0 %v1474_v0  ;;  %1107 = vmatprep.mubr.msk.bf16.mxu0 %vm1475_vm0, %v1474_v0  ;;  %v282_v4 = vpack.c.bf16 %v281_v3, %v281_v3  ;;  %s1476_s24 = smov 96   ;;  %s1477_s26 = smov 120   ;;  %vm354_vm2 = vcmask 64512   ;;  %vm420_vm4 = vcmask 1043456  }
  0x6d   : > { %1111 = vmatprep.subr.bf16.mxu1 %v1474_v0  ;;  %1113 = vmatprep.mubr.msk.bf16.mxu1 %vm1475_vm0, %v1474_v0  ;;  %s1478_s8 = smov 88   ;;  %s1479_s10 = smov 80   ;;  %v347_v24 = vshrl.u32 %v346_v23, 7  ;;  %v349_v25 = vand.u32 127, %v346_v23  ;;  %vm817_vm5 = vcmask 130048   ;;  %vm819_vm6 = vcmask 195584  }
  0x6e   : > { %1104 = vmatpush3.bf16.msra.mxu0 %v1259_v1  ;;  %s1480_s11 = smov 112   ;;  %s1481_s28 = smov 72  }
  0x6f   : > { %1105 = vmatprep.subr.bf16.mxu0 %v1474_v0  ;;  %s1482_s7 = smov 104   ;;  %vm350_vm3 = vcmp.le.s32.totalorder %v349_v25, %v347_v24  ;;  %s1483_s6 = smov 56  }
  0x70   : > { %s1484_s30 = smov 64   ;;  %s1485_s15 = smov 40  }
  0x71   : > { %s1486_s16 = smov 48   ;;  %s1056_s9 = sshll.u32 %s1693_s12, 5 }
  0x72   : > { %1106 = vmatpush3.bf16.msra.mxu0 %v1260_v2  ;;  %s1761_s29 = scalar_lea.vmem [#allocation9], %s1056_s9  ;;  %s1487_s17 = smov 8  }
  0x73   : > { %1117 = vmatprep.subr.bf16.mxu0 %v1474_v0  ;;  %p1902_p0 = scmp.ne.s32.totalorder %s1897_s23, 0 }
  0x75   : > { %1108 = vmatmul.mubr.msk.bf16.vlgmr.msra.gmra.mrb[0].mxu0 %vm299_vm1, %v282_v4 }
  0x76   : > { %1119 = vmatprep.mubr.msk.bf16.mxu0 %vm1475_vm0, %v1474_v0 }
 0x148   : > { %v337_v5 = vpop.f32.mrb[0].mxu0 }
 0x149   : > { %v343_v6 = vmul.f32 0.35355338, %v337_v5  ;;  %v1718_v7 = vpack.c.bf16 %v337_v5, %v337_v5  ;;  %v1109_v8 = vpop.f32.mrb[1].mxu0 }
 0x14a   : > { %v340_v9 = vpop.f32.mrb[2].mxu0 }
 0x14b   : > { %v344_v10 = vpack.c.bf16 %v343_v6, %v343_v6  ;;  %352 = vrot.lane.b32.xlu0 %v1718_v7, %s1476_s24  ;;  %v1110_v11 = vpop.f32.mrb[3].mxu0  ;;  %s1488_s24 = smov 16  }
 0x14d   : > { %465 = vrot.lane.b32.xlu1 %v344_v10, %s1477_s26  ;;  %s1489_s26 = smov 24  }
 0x14f   : > { %467 = vrot.lane.b32.xlu0 %v1718_v7, %s1478_s8  ;;  %s1077_s8 = sshll.u32 %s1545_s22, 7 }
 0x151   : > { %580 = vrot.lane.b32.xlu1 %v1718_v7, %s1479_s10 }
 0x153   : > { %578 = vrot.lane.b32.xlu0 %v344_v10, %s1480_s11 }
 0x155   : > { %693 = vrot.lane.b32.xlu1 %v1718_v7, %s1481_s28  ;;  %s1798_s28 = scalar_lea.hbm %s1888_s5, %s1077_s8 }
 0x157   : > { %691 = vrot.lane.b32.xlu0 %v344_v10, %s1482_s7  ;;  %s920_s7 = sshll.u32 %s1761_s29, 4  ;;  %s1801_s7 = int_to_ptr.vmem [resolvable:$true] %s920_s7 }
 0x1bd   : > { %v353_v12 = vpop.permute.xlu0 %352 }
 0x1be   : > { %v359_v13 = vsel %vm354_vm2, %v353_v12, 0 }
 0x1bf   : > { %1112 = vmatpush3.bf16.xpose.msra.mxu1 %v359_v13  ;;  %v466_v15 = vpop.permute.xlu1 %465 }
 0x1c0   : > { %1123 = vmatprep.subr.bf16.mxu1 %v1474_v0 }
 0x1c1   : > { %v468_v14 = vpop.permute.xlu0 %467 }
 0x1c2   : > { %v473_v16 = vsel %vm354_vm2, %v468_v14, 0 }
 0x1c3   : > { %v581_v17 = vpop.permute.xlu1 %580 }
 0x1c4   : > { %v586_v18 = vsel %vm354_vm2, %v581_v17, 0 }
 0x1c5   : > { %v579_v20 = vpop.permute.xlu0 %578 }
 0x1c6   : > { %1114 = vmatmul.mubr.msk.bf16.vlgmr.msra.gmra.mrb[0].mxu1 %vm354_vm2, %v344_v10 }
 0x1c7   : > { %1124 = vmatpush3.bf16.xpose.msra.mxu1 %v473_v16  ;;  %1125 = vmatprep.mubr.msk.bf16.mxu1 %vm1475_vm0, %v1474_v0  ;;  %v694_v19 = vpop.permute.xlu1 %693 }
 0x1c8   : > { %1135 = vmatprep.subr.bf16.mxu1 %v1474_v0  ;;  %v699_v21 = vsel %vm354_vm2, %v694_v19, 0 }
 0x1c9   : > { %v692_v22 = vpop.permute.xlu0 %691 }
 0x1ce   : > { %1126 = vmatmul.mubr.msk.bf16.vlgmr.msra.gmra.mrb[4].mxu1 %vm354_vm2, %v466_v15 }
 0x1cf   : > { %1136 = vmatpush3.bf16.xpose.msra.mxu1 %v586_v18  ;;  %1137 = vmatprep.mubr.msk.bf16.mxu1 %vm1475_vm0, %v1474_v0 }
 0x1d0   : > { %1147 = vmatprep.subr.bf16.mxu1 %v1474_v0 }
 0x1d6   : > { %1138 = vmatmul.mubr.msk.bf16.vlgmr.msra.gmra.mrb[8].mxu1 %vm354_vm2, %v579_v20 }
 0x1d7   : > { %1148 = vmatpush3.bf16.xpose.msra.mxu1 %v699_v21  ;;  %1149 = vmatprep.mubr.msk.bf16.mxu1 %vm1475_vm0, %v1474_v0 }
 0x1d8   : > { %1159 = vmatprep.subr.bf16.mxu1 %v1474_v0 }
 0x1de   : > { %1150 = vmatmul.mubr.msk.bf16.vlgmr.msra.gmra.mrb[12].mxu1 %vm354_vm2, %v692_v22 }
 0x1df   : > { %1163 = vmatprep.mubr.msk.bf16.mxu1 %vm1475_vm0, %v1474_v0 }
 0x299   : > { %v395_v26 = vpop.f32.mrb[0].mxu1 }
 0x29a   : > { %v401_v27 = vsel %vm350_vm3, %v395_v26, -inf  ;;  %v1115_v28 = vpop.f32.mrb[1].mxu1 }
 0x29b   : > { %v398_v29 = vpop.f32.mrb[2].mxu1  ;;  %v402_v30 = vsel %vm354_vm2, %v401_v27, -inf }
 0x29c   : > { %403 = vmax.xlane.f32.xlu1 %v402_v30  ;;  %v1116_v31 = vpop.f32.mrb[3].mxu1 }
 0x2a1   : > { %v509_v32 = vpop.f32.mrb[4].mxu1 }
 0x2a2   : > { %v515_v33 = vsel %vm350_vm3, %v509_v32, -inf  ;;  %v1127_v34 = vpop.f32.mrb[5].mxu1 }
 0x2a3   : > { %v512_v35 = vpop.f32.mrb[6].mxu1  ;;  %v516_v36 = vsel %vm354_vm2, %v515_v33, -inf }
 0x2a4   : > { %517 = vmax.xlane.f32.xlu0 %v516_v36  ;;  %v1128_v37 = vpop.f32.mrb[7].mxu1 }
 0x2a9   : > { %v622_v38 = vpop.f32.mrb[8].mxu1 }
 0x2aa   : > { %v628_v39 = vsel %vm350_vm3, %v622_v38, -inf  ;;  %v1139_v40 = vpop.f32.mrb[9].mxu1 }
 0x2ab   : > { %v625_v41 = vpop.f32.mrb[10].mxu1  ;;  %v629_v42 = vsel %vm354_vm2, %v628_v39, -inf  ;;  %v1262_v40 = vld [vmem:[#allocation7 + $0x8] sm:$0xff]  }
 0x2ac   : > { %630 = vmax.xlane.f32.xlu0 %v629_v42  ;;  %v1140_v43 = vpop.f32.mrb[11].mxu1 }
 0x2b1   : > { %v735_v44 = vpop.f32.mrb[12].mxu1 }
 0x2b2   : > { %v741_v45 = vsel %vm350_vm3, %v735_v44, -inf  ;;  %v1151_v46 = vpop.f32.mrb[13].mxu1 }
 0x2b3   : > { %v738_v47 = vpop.f32.mrb[14].mxu1  ;;  %v742_v48 = vsel %vm354_vm2, %v741_v45, -inf }
 0x2b4   : > { %743 = vmax.xlane.f32.xlu1 %v742_v48  ;;  %v1152_v49 = vpop.f32.mrb[15].mxu1 }
 0x329   : > { %v404_v50 = vpop.xlane.xlu1 %403 }
 0x32a   : > { %v405_v51 = vsub.f32 %v401_v27, %v404_v50 }
 0x32c   : > { %v406_v52 = vmul.f32 1.442695, %v405_v51 }
 0x32e   : > { %1263 = vpow2.f32 %v406_v52 }
 0x331   : > { %v518_v53 = vpop.xlane.xlu0 %517 }
 0x332   : > { %v519_v54 = vsub.f32 %v515_v33, %v518_v53 }
 0x334   : > { %v520_v55 = vmul.f32 1.442695, %v519_v54 }
 0x336   : > { %1265 = vpow2.f32 %v520_v55 }
 0x338   : > { %v1264_v56 = vpop.eup %1263 }
 0x339   : > { %v631_v57 = vpop.xlane.xlu0 %630  ;;  %v408_v58 = vsel %vm354_vm2, %v1264_v56, 0.0 }
 0x33a   : > { %v632_v59 = vsub.f32 %v628_v39, %v631_v57  ;;  %409 = vadd.xlane.f32.xlu0 %v408_v58  ;;  %v1261_v39 = vld [vmem:[#allocation7] sm:$0xff]  }
 0x33b   : > { %1160 = vmatpush3.bf16.msra.mxu1 %v1261_v39 }
 0x33c   : > { %v633_v60 = vmul.f32 1.442695, %v632_v59  ;;  %1161 = vmatprep.subr.bf16.mxu1 %v1474_v0 }
 0x33e   : > { %1267 = vpow2.f32 %v633_v60 }
 0x33f   : > { %1162 = vmatpush3.bf16.msra.mxu1 %v1262_v40 }
 0x340   : > { %v1266_v61 = vpop.eup %1265 }
 0x341   : > { %v522_v62 = vsel %vm354_vm2, %v1266_v61, 0.0  ;;  %v744_v2 = vpop.xlane.xlu1 %743 }
 0x342   : > { %523 = vadd.xlane.f32.xlu1 %v522_v62  ;;  %v745_v3 = vsub.f32 %v741_v45, %v744_v2 }
 0x344   : > { %v746_v4 = vmul.f32 1.442695, %v745_v3 }
 0x346   : > { %1269 = vpow2.f32 %v746_v4 }
 0x348   : > { %v1268_v63 = vpop.eup %1267 }
 0x349   : > { %v635_v1 = vsel %vm354_vm2, %v1268_v63, 0.0 }
 0x34a   : > { %636 = vadd.xlane.f32.xlu0 %v635_v1 }
 0x350   : > { %v1270_v5 = vpop.eup %1269 }
 0x351   : > { %v748_v6 = vsel %vm354_vm2, %v1270_v5, 0.0 }
 0x353   : > { %530 = vrot.lane.b32.xlu1 %v1718_v7, %s1483_s6  ;;  %s895_s6 = scalar_lea.sflag [#allocation10], %s1693_s12 }
 0x360   : > { %415 = vrot.lane.b32.xlu0 %v1718_v7, %s1484_s30  ;;  %s1365_s30 = scalar_lea.vmem %s1801_s7, 512 }
 0x361   : > { %p1366_p11 = scmp.ne.s32.totalorder %s1801_s7, %s1365_s30 }
 0x363   : > { %p1367_p1 = pnand %p1366_p11, %p1902_p0 }
 0x364   : > { %756 = vrot.lane.b32.xlu0 %v1718_v7, %s1485_s15  ;;  %s1490_s15 = smov [#allocation9]  }
 0x365   : > { %p1368_p3 = pneg %p1367_p1 }
 0x377   : > { %749 = vadd.xlane.f32.xlu1 %v748_v6 }
 0x388   : > { %643 = vrot.lane.b32.xlu1 %v1718_v7, %s1486_s16  ;;  %s1369_s16 = sshll.u32 %s1490_s15, 4  ;;  %s1370_s16 = int_to_ptr.vmem [resolvable:$false] %s1369_s16 }
 0x389   : > { %s1371_s9 = scalar_lea.vmem %s1370_s16, 1024  ;;  %p1372_p7 = scmp.lt.s32.totalorder %s1801_s7, %s1370_s16 }
 0x38a   : > { %p1373_p9 = scmp.lt.s32.totalorder %s1371_s9, %s1365_s30 }
 0x38c   : > { %p1374_p12 = por %p1373_p9, %p1372_p7 }
 0x38e   : > { %p1375_p2 = pnand %p1374_p12, %p1368_p3 }
 0x3c7   : > { %v410_v8 = vpop.xlane.xlu0 %409 }
 0x3c8   : > { %1271 = vrcp.f32 %v410_v8 }
 0x3cf   : > { %v524_v9 = vpop.xlane.xlu1 %523 }
 0x3d0   : > { %1273 = vrcp.f32 %v524_v9 }
 0x3d2   : > { %v1272_v10 = vpop.eup %1271 }
 0x3d3   : > { %v412_v11 = vmul.f32 %v1272_v10, %v1264_v56  ;;  %v531_v16 = vpop.permute.xlu1 %530 }
 0x3d4   : > { %v536_v18 = vsel %vm420_vm4, %v531_v16, 0 }
 0x3d5   : > { %413 = vst.msk [vmem:[%s1761_s29] sm:$0xff] %vm354_vm2, %v412_v11  ;;  %v414_v17 = vpack.c.bf16 %v412_v11, %v412_v11 }
 0x3d7   : > { %v637_v12 = vpop.xlane.xlu0 %636 }
 0x3d8   : > { %1275 = vrcp.f32 %v637_v12 }
 0x3da   : > { %v1274_v13 = vpop.eup %1273 }
 0x3db   : > { %v526_v14 = vmul.f32 %v1274_v13, %v1266_v61  ;;  %v416_v7 = vpop.permute.xlu0 %415 }
 0x3dc   : > { %v422_v15 = vsel %vm420_vm4, %v416_v7, 0 }
 0x3dd   : > { %1063 = vst.msk [vmem:[%s1761_s29 + $0x8] sm:$0xff] %vm354_vm2, %v526_v14  ;;  %1118 = vmatpush3.bf16.msra.mxu0 %v422_v15  ;;  %v529_v21 = vpack.c.bf16 %v526_v14, %v526_v14 }
 0x3de   : > { %1129 = vmatprep.subr.bf16.mxu0 %v1474_v0 }
 0x3df   : > { %v757_v25 = vpop.permute.xlu0 %756 }
 0x3e0   : > { %1120 = vmatmul.mubr.msk.bf16.vlgmr.msra.gmra.mrb[4].mxu0 %vm354_vm2, %v414_v17  ;;  %v762_v27 = vsel %vm420_vm4, %v757_v25, 0 }
 0x3e1   : > { %1130 = vmatpush3.bf16.msra.mxu0 %v536_v18  ;;  %1131 = vmatprep.mubr.msk.bf16.mxu0 %vm1475_vm0, %v1474_v0 }
 0x3e2   : > { %v1276_v19 = vpop.eup %1275  ;;  %1141 = vmatprep.subr.bf16.mxu0 %v1474_v0 }
 0x3e3   : > { %v639_v20 = vmul.f32 %v1276_v19, %v1268_v63 }
 0x3e5   : > { %1066 = vst.msk [vmem:[%s1761_s29 + $0x10] sm:$0xff] %vm354_vm2, %v639_v20  ;;  %v642_v26 = vpack.c.bf16 %v639_v20, %v639_v20 }
 0x3e8   : > { %1132 = vmatmul.mubr.msk.bf16.vlgmr.msra.gmra.mrb[8].mxu0 %vm354_vm2, %v529_v21 }
 0x3e9   : > { %1143 = vmatprep.mubr.msk.bf16.mxu0 %vm1475_vm0, %v1474_v0 }
 0x404   : > { %v750_v22 = vpop.xlane.xlu1 %749 }
 0x405   : > { %1277 = vrcp.f32 %v750_v22 }
 0x408   : > { %v644_v23 = vpop.permute.xlu1 %643 }
 0x409   : > { %v649_v24 = vsel %vm420_vm4, %v644_v23, 0 }
 0x40a   : > { %1142 = vmatpush3.bf16.msra.mxu0 %v649_v24 }
 0x40b   : > { %1153 = vmatprep.subr.bf16.mxu0 %v1474_v0 }
 0x40d   : > { %1144 = vmatmul.mubr.msk.bf16.vlgmr.msra.gmra.mrb[12].mxu0 %vm354_vm2, %v642_v26 }
 0x40e   : > { %1154 = vmatpush3.bf16.msra.mxu0 %v762_v27  ;;  %1155 = vmatprep.mubr.msk.bf16.mxu0 %vm1475_vm0, %v1474_v0 }
 0x40f   : > { %v1278_v28 = vpop.eup %1277 }
 0x410   : > { %v752_v29 = vmul.f32 %v1278_v28, %v1270_v5 }
 0x412   : > { %1069 = vst.msk [vmem:[%s1761_s29 + $0x18] sm:$0xff] %vm354_vm2, %v752_v29  ;;  %v755_v30 = vpack.c.bf16 %v752_v29, %v752_v29 }
 0x415   : > { %1156 = vmatmul.mubr.msk.bf16.vlgmr.msra.gmra.mrb[16].mxu0 %vm354_vm2, %v755_v30 }
 0x4b3   : > { %v458_v31 = vpop.f32.mrb[4].mxu0 }
 0x4b4   : > { %v1121_v32 = vpop.f32.mrb[5].mxu0 }
 0x4b5   : > { %v461_v33 = vpop.f32.mrb[6].mxu0 }
 0x4b6   : > { %v1122_v34 = vpop.f32.mrb[7].mxu0 }
 0x4bb   : > { %v572_v35 = vpop.f32.mrb[8].mxu0 }
 0x4bc   : > { %805 = vrot.lane.b32.xlu1 %v572_v35, %s1487_s17  ;;  %v1133_v36 = vpop.f32.mrb[9].mxu0 }
 0x4bd   : > { %v575_v37 = vpop.f32.mrb[10].mxu0 }
 0x4be   : > { %v1134_v38 = vpop.f32.mrb[11].mxu0 }
 0x4e0   : > { %v685_v41 = vpop.f32.mrb[12].mxu0 }
 0x4e1   : > { %809 = vrot.lane.b32.xlu0 %v685_v41, %s1488_s24  ;;  %v1145_v42 = vpop.f32.mrb[13].mxu0 }
 0x4e2   : > { %v688_v43 = vpop.f32.mrb[14].mxu0 }
 0x4e3   : > { %v1146_v44 = vpop.f32.mrb[15].mxu0 }
 0x4e8   : > { %v798_v45 = vpop.f32.mrb[16].mxu0 }
 0x4e9   : > { %813 = vrot.lane.b32.xlu1 %v798_v45, %s1489_s26  ;;  %v1157_v46 = vpop.f32.mrb[17].mxu0 }
 0x4ea   : > { %v801_v47 = vpop.f32.mrb[18].mxu0 }
 0x4eb   : > { %v1158_v48 = vpop.f32.mrb[19].mxu0 }
 0x52e   : > { %v806_v49 = vpop.permute.xlu1 %805 }
 0x52f   : > { %v816_v50 = vsel %vm354_vm2, %v458_v31, %v806_v49 }
 0x553   : > { %v810_v0 = vpop.permute.xlu0 %809 }
 0x554   : > { %v818_v51 = vsel %vm817_vm5, %v816_v50, %v810_v0 }
 0x55b   : > { %v814_v52 = vpop.permute.xlu1 %813 }
 0x55c   : > { %v820_v53 = vsel %vm819_vm6, %v818_v51, %v814_v52 }
 0x55d   : > { %v821_v54 = vpack.c.bf16 %v820_v53, %v820_v53 }
 0x55f   : > { %1164 = vmatmul.mubr.msk.bf16.vlgmr.msra.gmra.mrb[16].mxu1 %vm299_vm1, %v821_v54 }
 0x560   : > { %1378 = shalt.err (!%p1375_p2)
}
 0x561   : > { %s1379_s29 = scalar_lea.hbm %s1798_s28, 512  ;;  %s1383_s10 = scalar_lea.hbm %s1888_s5, 1024 }
 0x562   : > { %p1380_p13 = scmp.ne.s32.totalorder %s1798_s28, %s1379_s29  ;;  %p1384_p4 = scmp.lt.u32.totalorder %s1798_s28, %s1888_s5 }
 0x563   : > { %p1385_p5 = scmp.lt.u32.totalorder %s1383_s10, %s1379_s29  ;;  %p1387_p11 = scmp.lt.u32.totalorder %s1379_s29, %s1798_s28 }
 0x564   : > { %p1381_p6 = pnand %p1380_p13, %p1902_p0 }
 0x565   : > { %p1386_p8 = por %p1385_p5, %p1384_p4 }
 0x566   : > { %p1382_p10 = pneg %p1381_p6 }
 0x567   : > { %p1388_p1 = por %p1387_p11, %p1386_p8 }
 0x569   : > { %p1389_p3 = pnand %p1388_p1, %p1382_p10 }
 0x56b   : > { %1392 = shalt.err (!%p1389_p3)
}
 0x56c   : > { %s1491_s30 = smov 128   ;;  %s1492_s16 = smov 256   ;;  %v1071_v55 = vld [vmem:[%s1886_s3] ss:$0 sm:$0xff] }
 0x56d   : > { %1178 = dma.vmem_to_hbm [thread:$0]  (%p1902_p0), %s1801_s7, 512, %s1798_s28, %s895_s6, %s1491_s30, %s1492_s16, %s1487_s17  }
 0x56e   : > { %s272_s29 = scalar_lea.vmem [#allocation8], %s1052_s13  ;;  %s1838_s15 = scalar_lea.hbm %s1887_s4, %s1077_s8 }
 0x56f   : > { %s908_s26 = sshll.u32 %s272_s29, 4  ;;  %s890_s13 = scalar_lea.sflag [#allocation4], %s1693_s12  ;;  %s1840_s26 = int_to_ptr.vmem [resolvable:$true] %s908_s26 }
 0x570   : > { %s1393_s17 = scalar_lea.vmem %s1840_s26, 128  ;;  %s1493_s22 = smov [#allocation8]  }
 0x571   : > { %p1394_p7 = scmp.ne.s32.totalorder %s1840_s26, %s1393_s17  ;;  %s1397_s28 = sshll.u32 %s1493_s22, 4  ;;  %s1398_s28 = int_to_ptr.vmem [resolvable:$false] %s1397_s28 }
 0x572   : > { %s1399_s8 = scalar_lea.vmem %s1398_s28, 256  ;;  %p1400_p2 = scmp.lt.s32.totalorder %s1840_s26, %s1398_s28 }
 0x573   : > { %p1395_p9 = pnand %p1394_p7, %p1902_p0  ;;  %p1401_p13 = scmp.lt.s32.totalorder %s1399_s8, %s1393_s17 }
 0x575   : > { %p1396_p12 = pneg %p1395_p9  ;;  %p1402_p6 = por %p1401_p13, %p1400_p2 }
 0x577   : > { %p1403_p10 = pnand %p1402_p6, %p1396_p12 }
 0x632   : > { %v882_v56 = vpop.f32.mrb[16].mxu1 }
 0x633   : > { %v883_v57 = vadd.f32 %v1071_v55, %v882_v56  ;;  %v1165_v58 = vpop.f32.mrb[17].mxu1 }
 0x634   : > { %v885_v59 = vpop.f32.mrb[18].mxu1 }
 0x635   : > { %v1166_v60 = vpop.f32.mrb[19].mxu1  ;;  %888 = vst.msk [vmem:[%s272_s29] sm:$0xff] %vm299_vm1, %v883_v57 }
 0x636   : > { %1406 = shalt.err (!%p1403_p10)
}
 0x637   : > { %s1407_s12 = scalar_lea.hbm %s1838_s15, 128  ;;  %s1411_s30 = scalar_lea.hbm %s1887_s4, 256 }
 0x638   : > { %p1408_p4 = scmp.ne.s32.totalorder %s1838_s15, %s1407_s12  ;;  %p1412_p11 = scmp.lt.u32.totalorder %s1838_s15, %s1887_s4 }
 0x639   : > { %p1413_p1 = scmp.lt.u32.totalorder %s1411_s30, %s1407_s12  ;;  %p1415_p7 = scmp.lt.u32.totalorder %s1407_s12, %s1838_s15 }
 0x63a   : > { %p1409_p5 = pnand %p1408_p4, %p1902_p0 }
 0x63b   : > { %p1414_p3 = por %p1413_p1, %p1412_p11 }
 0x63c   : > { %p1410_p8 = pneg %p1409_p5 }
 0x63d   : > { %p1416_p9 = por %p1415_p7, %p1414_p3 }
 0x63f   : > { %p1417_p12 = pnand %p1416_p9, %p1410_p8 }
 0x641   : > { %1420 = shalt.err (!%p1417_p12)
}
 0x642   : > { %1177 = dma.vmem_to_hbm [thread:$0]  (%p1902_p0), %s1840_s26, 128, %s1838_s15, %s890_s13  }
 0x643 PF: > { %s935_s24 = sand.u32 1, %s1455_s18   ;;  %p1903_p2 = scmp.ne.s32.totalorder %s1893_s25, 0 }
 0x644   : > { %p1904_p13 = scmp.ge.s32.totalorder %s1467_s21, 2  ;;  %s936_s29 = scalar_lea.sflag [#allocation4], %s935_s24 }
 0x646   : > { %p1193_p6 = pnand %p1904_p13, %p1903_p2 }
 0x648   : > { %1446 = dma.done.wait (!%p1193_p6), %s936_s29, 128  }
 0x649   : > { %1448 = vsyncadd (!%p1193_p6), %s936_s29, 4294967168  ;;  %s945_s10 = scalar_lea.sflag [#allocation10], %s935_s24 }
 0x64a   : > { %1450 = dma.done.wait (!%p1193_p6), %s945_s10, 512  }
 0x64b   : > { %1452 = vsyncadd (!%p1193_p6), %s945_s10, 4294966784  ;;  %p23_p0 = scmp.ge.s32.totalorder %s1634_s14, 4   ;;  %s1905_s18 = smov %s1459_s19 }
 0x64c   : > { %s1906_s19 = smov %s1463_s20  ;;  %s1907_s20 = smov %s1650_s27 }
 0x64d   : > { %s1908_s21 = smov %s1634_s14  ;;  %25 = sbr.rel (!%p23_p0) target bundleno = 8 (0x8), region = 109 }
 0x654   :  { %950 = vsyncpa [#allocation3], 1 }
 0x655   :  { %952 = vsyncpa [#allocation3 + $0x1], 1 }
 0x656   :  { %953 = vsyncpa [#allocation6], 1 }
 0x657   :  { %954 = vsyncpa [#allocation4], 1 }
 0x658   :  { %956 = vsyncpa [#allocation4 + $0x1], 1 }
 0x659   :  { %957 = vsyncpa [#allocation10], 1 }
 0x65a   :  { %959 = vsyncpa [#allocation10 + $0x1], 1 }

</bundles_post_ra>
